<compile_context>
chip_gen: v7x
topology: tpu7x:2x2x1
jax: 0.10.0
libtpu: 0.0.40
codegen_flags: <defaults>
</compile_context>

<pallas_src>
import jax
import jax.numpy as jnp
from jax.experimental import pallas as pl
from jax.experimental.pallas import tpu as pltpu


def make_mlp_kernel(n_hidden):
    """Fused-MLP kernel body for `n_hidden` (Linear+ReLU) layers + Linear(out=1).

    refs = (x_ref,
            w0_ref, b0_ref, ..., w{n-1}_ref, b{n-1}_ref,   # hidden layers
            wl_ref, bl_ref,                                # final layer (8,K)/(1,1)
            o_ref)                                         # (1, TILE_B)
    """

    def kernel(*refs):
        x_ref = refs[0]
        o_ref = refs[-1]

        h = x_ref[...]                          # (TILE_B, input_dim) f32
        for i in range(n_hidden):
            w = refs[1 + 2 * i][...]            # (in, out)  bf16, VMEM-resident
            b = refs[2 + 2 * i][...]            # (1, out)   f32
            h = jnp.dot(h.astype(w.dtype), w,
                        preferred_element_type=jnp.float32)   # MXU, f32 accumulate
            h = jnp.maximum(h + b, 0.0)         # bias + ReLU in f32 on the VPU

        wl = refs[1 + 2 * n_hidden][...]        # (8, K) bf16; row 0 holds real weights
        bl = refs[2 + 2 * n_hidden][...]        # (1, 1) f32

        # Final Linear(out=1), transposed: (8, K) . (TILE_B, K)^T -> (8, TILE_B).
        # Row 0 is the real output row; the resulting tile is lane-dense, so the
        # HBM writeback is full-width vst instead of masked (TILE_B, 1) stores.
        out_rows = jax.lax.dot_general(
            wl, h.astype(wl.dtype),
            dimension_numbers=(((1,), (1,)), ((), ())),
            preferred_element_type=jnp.float32)
        o_ref[...] = (out_rows[0:1, :] + bl).astype(o_ref.dtype)

    return kernel


def mlp_forward(x, params, *, tile_b=512):
    """Run the fused MLP Pallas kernel.

    x:      (batch, input_dim) float32
    params: [(W_i (in,out) bf16, b_i (1,out) f32)] for hidden layers, followed by
            the final layer packed as (W_last (8, K) bf16 [row 0 real], b_last (1,1) f32).
    returns (batch,) float32 -- matches the PyTorch forward()'s squeeze(1).
    """
    batch, input_dim = x.shape
    n_hidden = len(params) - 1

    # Pad the batch to a multiple of the tile so every grid step is full.
    padded = ((batch + tile_b - 1) // tile_b) * tile_b
    if padded != batch:
        x = jnp.pad(x, ((0, padded - batch), (0, 0)))
    num_tiles = padded // tile_b

    kernel = make_mlp_kernel(n_hidden)

    flat_args = [x]
    in_specs = [pl.BlockSpec((tile_b, input_dim), lambda i: (i, 0))]
    for w, b in params:
        flat_args.append(w)
        flat_args.append(b)
        # Constant index_map -> parameters are DMA'd once and stay VMEM-resident
        # across all batch tiles (no re-fetch per grid step).
        in_specs.append(pl.BlockSpec(w.shape, lambda i: (0, 0)))
        in_specs.append(pl.BlockSpec(b.shape, lambda i: (0, 0)))

    # Lane-dense output: batch lives on the lane axis, one (1, tile_b) slab per tile.
    out_spec = pl.BlockSpec((1, tile_b), lambda i: (0, i))

    out = pl.pallas_call(
        kernel,
        out_shape=jax.ShapeDtypeStruct((1, padded), jnp.float32),
        grid=(num_tiles,),
        in_specs=in_specs,
        out_specs=out_spec,
        compiler_params=pltpu.CompilerParams(
            dimension_semantics=("parallel",),   # megacore / 2-TC sharding of batch grid
            vmem_limit_bytes=32 * 1024 * 1024,
        ),
    )(*flat_args)
    return out[0, :batch]  # squeeze(1)


def init_params(key, input_dim, unit):
    """Deterministic init mimicking the module's layer shapes.

    Hidden layers -> W (in, out) bf16, b (1, out) f32.
    Final Linear(K, 1) -> packed transposed + padded to (8, K) bf16, bias (1, 1) f32.
    """
    dims = [input_dim] + list(unit) + [1]
    params = []
    for i in range(len(dims) - 1):
        fan_in, fan_out = dims[i], dims[i + 1]
        key, kw, kb = jax.random.split(key, 3)
        bound = 1.0 / (fan_in ** 0.5)  # PyTorch-style uniform bound
        w = jax.random.uniform(kw, (fan_in, fan_out), jnp.float32, -bound, bound)
        b = jax.random.uniform(kb, (1, fan_out), jnp.float32, -bound, bound)
        if i < len(dims) - 2:
            params.append((w.astype(jnp.bfloat16), b))
        else:
            # Final Linear(fan_in, 1): store transposed (1, K) padded to 8 MXU rows.
            wl = jnp.zeros((8, fan_in), jnp.float32).at[0, :].set(w[:, 0])
            params.append((wl.astype(jnp.bfloat16), b.reshape(1, 1)))
    return params


def reference_forward(x, params):
    """Pure-JAX f32 reference with the same (bf16-rounded) parameters."""
    h = x
    for w, b in params[:-1]:
        h = jnp.maximum(h @ w.astype(jnp.float32) + b, 0.0)
    wl, bl = params[-1]
    out = h @ wl[0:1, :].astype(jnp.float32).T + bl   # (batch, 1)
    return out[:, 0]


if __name__ == "__main__":
    key = jax.random.PRNGKey(0)
    batch, input_dim = 300, 32          # batch deliberately NOT a multiple of TILE_B
    unit = [64, 32]
    tile_b = 128                        # sweepable; 512-1024 for production batches

    key, kx = jax.random.split(key)
    x = jax.random.normal(kx, (batch, input_dim), jnp.float32)
    params = init_params(key, input_dim, unit)

    out = mlp_forward(x, params, tile_b=tile_b)
    out = jax.block_until_ready(out)

    ref = reference_forward(x, params)
    assert out.shape == (batch,), out.shape
    # bf16 matmul operands with f32 accumulation: ~1e-3 level deviation vs f32 ref.
    assert jnp.allclose(out, ref, atol=2e-2, rtol=2e-2), (out[:8], ref[:8])

    print("KERNEL_OK")
</pallas_src>

<mosaic_0001>
module attributes {stable_mosaic.version = 11 : i64} {
  func.func @kernel(%arg0: i32, %arg1: memref<128x32xf32, #tpu.memory_space<vmem>>, %arg2: memref<32x64xbf16, #tpu.memory_space<vmem>>, %arg3: memref<1x64xf32, #tpu.memory_space<vmem>>, %arg4: memref<64x32xbf16, #tpu.memory_space<vmem>>, %arg5: memref<1x32xf32, #tpu.memory_space<vmem>>, %arg6: memref<8x32xbf16, #tpu.memory_space<vmem>>, %arg7: memref<1x1xf32, #tpu.memory_space<vmem>>, %arg8: memref<1x128xf32, #tpu.memory_space<vmem>>) attributes {dimension_semantics = [#tpu.dimension_semantics<parallel>], iteration_bounds = array<i64: 3>, scalar_prefetch = 0 : i64, scratch_operands = 0 : i64, tpu.core_type = #tpu.core_type<tc>, window_params = [{transform_indices = @transform_0, window_bounds = array<i64: 128, 32>}, {pipeline_mode = #tpu.pipeline_mode<synchronous>, transform_indices = @transform_1, window_bounds = array<i64: 32, 64>}, {pipeline_mode = #tpu.pipeline_mode<synchronous>, transform_indices = @transform_2, window_bounds = array<i64: 1, 64>}, {pipeline_mode = #tpu.pipeline_mode<synchronous>, transform_indices = @transform_3, window_bounds = array<i64: 64, 32>}, {pipeline_mode = #tpu.pipeline_mode<synchronous>, transform_indices = @transform_4, window_bounds = array<i64: 1, 32>}, {pipeline_mode = #tpu.pipeline_mode<synchronous>, transform_indices = @transform_5, window_bounds = array<i64: 8, 32>}, {pipeline_mode = #tpu.pipeline_mode<synchronous>, transform_indices = @transform_6, window_bounds = array<i64: 1, 1>}, {transform_indices = @transform_7, window_bounds = array<i64: 1, 128>}]} {
    %c0 = arith.constant 0 : index
    %c0_0 = arith.constant 0 : index
    %0 = vector.load %arg1[%c0, %c0_0] : memref<128x32xf32, #tpu.memory_space<vmem>>, vector<128x32xf32>
    %c0_1 = arith.constant 0 : index
    %c0_2 = arith.constant 0 : index
    %1 = vector.load %arg2[%c0_1, %c0_2] : memref<32x64xbf16, #tpu.memory_space<vmem>>, vector<32x64xbf16>
    %c0_3 = arith.constant 0 : index
    %c0_4 = arith.constant 0 : index
    %2 = vector.load %arg3[%c0_3, %c0_4] : memref<1x64xf32, #tpu.memory_space<vmem>>, vector<1x64xf32>
    %3 = arith.truncf %0 : vector<128x32xf32> to vector<128x32xbf16>
    %cst = arith.constant dense<0.000000e+00> : vector<128x64xf32>
    %4 = tpu.matmul %3, %1, %cst {dimension_numbers = #tpu.dot_dimension_numbers<[1], [0], [0], [1], [0, 0, 1, 1], [], []>} : vector<128x32xbf16>, vector<32x64xbf16>, vector<128x64xf32> -> vector<128x64xf32>
    %5 = vector.broadcast %2 : vector<1x64xf32> to vector<128x64xf32>
    %6 = arith.addf %4, %5 : vector<128x64xf32>
    %cst_5 = arith.constant 0.000000e+00 : f32
    %7 = vector.broadcast %cst_5 : f32 to vector<128x64xf32>
    %8 = arith.maximumf %6, %7 : vector<128x64xf32>
    %c0_6 = arith.constant 0 : index
    %c0_7 = arith.constant 0 : index
    %9 = vector.load %arg4[%c0_6, %c0_7] : memref<64x32xbf16, #tpu.memory_space<vmem>>, vector<64x32xbf16>
    %c0_8 = arith.constant 0 : index
    %c0_9 = arith.constant 0 : index
    %10 = vector.load %arg5[%c0_8, %c0_9] : memref<1x32xf32, #tpu.memory_space<vmem>>, vector<1x32xf32>
    %11 = arith.truncf %8 : vector<128x64xf32> to vector<128x64xbf16>
    %cst_10 = arith.constant dense<0.000000e+00> : vector<128x32xf32>
    %12 = tpu.matmul %11, %9, %cst_10 {dimension_numbers = #tpu.dot_dimension_numbers<[1], [0], [0], [1], [0, 0, 1, 1], [], []>} : vector<128x64xbf16>, vector<64x32xbf16>, vector<128x32xf32> -> vector<128x32xf32>
    %13 = vector.broadcast %10 : vector<1x32xf32> to vector<128x32xf32>
    %14 = arith.addf %12, %13 : vector<128x32xf32>
    %cst_11 = arith.constant 0.000000e+00 : f32
    %15 = vector.broadcast %cst_11 : f32 to vector<128x32xf32>
    %16 = arith.maximumf %14, %15 : vector<128x32xf32>
    %c0_12 = arith.constant 0 : index
    %c0_13 = arith.constant 0 : index
    %17 = vector.load %arg6[%c0_12, %c0_13] : memref<8x32xbf16, #tpu.memory_space<vmem>>, vector<8x32xbf16>
    %c0_14 = arith.constant 0 : index
    %c0_15 = arith.constant 0 : index
    %18 = vector.load %arg7[%c0_14, %c0_15] : memref<1x1xf32, #tpu.memory_space<vmem>>, vector<1x1xf32>
    %19 = arith.truncf %16 : vector<128x32xf32> to vector<128x32xbf16>
    %cst_16 = arith.constant dense<0.000000e+00> : vector<8x128xf32>
    %20 = tpu.matmul %17, %19, %cst_16 {dimension_numbers = #tpu.dot_dimension_numbers<[1], [1], [0], [0], [0, 0, 1, 0], [], []>} : vector<8x32xbf16>, vector<128x32xbf16>, vector<8x128xf32> -> vector<8x128xf32>
    %21 = vector.extract_strided_slice %20 {offsets = [0, 0], sizes = [1, 128], strides = [1, 1]} : vector<8x128xf32> to vector<1x128xf32>
    %22 = vector.broadcast %18 : vector<1x1xf32> to vector<1x128xf32>
    %23 = arith.addf %21, %22 : vector<1x128xf32>
    %c0_17 = arith.constant 0 : index
    %c0_18 = arith.constant 0 : index
    %24 = vector.load %arg8[%c0_17, %c0_18] : memref<1x128xf32, #tpu.memory_space<vmem>>, vector<1x128xf32>
    tpu.vector_store %arg8[%c0_17, %c0_18], %23 {strides = array<i32>} : memref<1x128xf32, #tpu.memory_space<vmem>>, vector<1x128xf32>,
    return
  }
  func.func @transform_0(%arg0: i32) -> (i32, i32) {
    %c0_i32 = arith.constant 0 : i32
    %c0_i32_0 = arith.constant 0 : i32
    return %arg0, %c0_i32 : i32, i32
  }
  func.func @transform_1(%arg0: i32) -> (i32, i32) {
    %c0_i32 = arith.constant 0 : i32
    %c0_i32_0 = arith.constant 0 : i32
    %c0_i32_1 = arith.constant 0 : i32
    return %c0_i32, %c0_i32_0 : i32, i32
  }
  func.func @transform_2(%arg0: i32) -> (i32, i32) {
    %c0_i32 = arith.constant 0 : i32
    %c0_i32_0 = arith.constant 0 : i32
    %c0_i32_1 = arith.constant 0 : i32
    return %c0_i32, %c0_i32_0 : i32, i32
  }
  func.func @transform_3(%arg0: i32) -> (i32, i32) {
    %c0_i32 = arith.constant 0 : i32
    %c0_i32_0 = arith.constant 0 : i32
    %c0_i32_1 = arith.constant 0 : i32
    return %c0_i32, %c0_i32_0 : i32, i32
  }
  func.func @transform_4(%arg0: i32) -> (i32, i32) {
    %c0_i32 = arith.constant 0 : i32
    %c0_i32_0 = arith.constant 0 : i32
    %c0_i32_1 = arith.constant 0 : i32
    return %c0_i32, %c0_i32_0 : i32, i32
  }
  func.func @transform_5(%arg0: i32) -> (i32, i32) {
    %c0_i32 = arith.constant 0 : i32
    %c0_i32_0 = arith.constant 0 : i32
    %c0_i32_1 = arith.constant 0 : i32
    return %c0_i32, %c0_i32_0 : i32, i32
  }
  func.func @transform_6(%arg0: i32) -> (i32, i32) {
    %c0_i32 = arith.constant 0 : i32
    %c0_i32_0 = arith.constant 0 : i32
    %c0_i32_1 = arith.constant 0 : i32
    return %c0_i32, %c0_i32_0 : i32, i32
  }
  func.func @transform_7(%arg0: i32) -> (i32, i32) {
    %c0_i32 = arith.constant 0 : i32
    %c0_i32_0 = arith.constant 0 : i32
    return %c0_i32, %arg0 : i32, i32
  }
}

</mosaic_0001>

<bundles_post_ra>
// kernel: tpu_custom_call.1
= control target key start
LH: loop header
LB: loop body
LE: loop exit
PB: predicated region body
PF: predicated region fallthrough
CT: control target
= control target key end

     0   :  { %s1274_s0 = inlined_call_operand.vmem [shape: f32[384,32], index: 0, kind: input, shape index: {}]   ;;  %s1275_s1 = inlined_call_operand.vmem [shape: bf16[32,64], index: 1, kind: input, shape index: {}]   ;;  %s1276_s2 = inlined_call_operand.vmem [shape: f32[1,64], index: 2, kind: input, shape index: {}]   ;;  %s1277_s3 = inlined_call_operand.vmem [shape: bf16[64,32], index: 3, kind: input, shape index: {}]   ;;  %s1278_s4 = inlined_call_operand.vmem [shape: f32[1,32], index: 4, kind: input, shape index: {}]   ;;  %s1279_s5 = inlined_call_operand.vmem [shape: bf16[8,32], index: 5, kind: input, shape index: {}]   ;;  %s1280_s6 = inlined_call_operand.<no memory space> [shape: f32[1,1], index: 6, kind: input, shape index: {}]   ;;  %s1281_s7 = inlined_call_operand.hbm [shape: f32[1,384], index: 7, kind: output, shape index: {}]  }
   0x1   :  { %v12_v0 = vstv %s1280_s6 }
   0x2   :  { %13 = vst [vmem:[#allocation2] sm:$0x1] %v12_v0 }
   0x3   :  { %14 = vsyncpa [#allocation4], 0 }
   0x4   :  { %16 = vsyncpa [#allocation4 + $0x1], 0  ;;  %s1096_s26 = smov 0   ;;  %s1098_s27 = smov 0  }
   0x5   :  { %s1100_s28 = smov 0   ;;  %s1102_s29 = smov 0  }
   0x6 LB: > { %s806_s6 = sadd.s32 4294967295, %s1047_s29   ;;  %s807_s30 = sadd.s32 4294967294, %s1047_s29   ;;  %s1047_s29 = sphi %s1102_s29, %s1287_s29   ;;  %s1043_s28 = sphi %s1100_s28, %s1286_s28   ;;  %s1039_s27 = sphi %s1098_s27, %s1285_s27   ;;  %s1035_s26 = sphi %s1096_s26, %s1284_s26  }
   0x7   : > { %s1119_s8 = sadd.s32 1, %s1047_s29   ;;  %s181_s9 = sadd.s32 1, %s1043_s28 }
   0x8   : > { %s178_s10 = ssub.s32 %s1047_s29, %s1119_s8  ;;  %p191_p0 = scmp.ne.s32.totalorder %s1043_s28, %s1039_s27 }
   0x9   : > { %p179_p1 = scmp.eq.s32.totalorder %s178_s10, 0  ;;  %p192_p2 = scmp.eq.s32.totalorder %s806_s6, 2 }
   0xa   : > { %p197_p3 = scmp.ne.s32.totalorder %s1039_s27, %s1035_s26  ;;  %p198_p4 = scmp.eq.s32.totalorder %s807_s30, 2 }
   0xb   : > { %s1129_s11 = scalar_select %p179_p1, %s1043_s28, %s181_s9  }
   0xc   : > { %p1131_p5 = por %p192_p2, %p191_p0  ;;  %p1135_p6 = por %p198_p4, %p197_p3 }
   0xd   : > { %p810_p7 = scmp.ge.s32.totalorder %s1047_s29, 1  ;;  %p243_p8 = scmp.lt.s32.totalorder %s1047_s29, 4 }
   0xf   : > { %p244_p9 = pnand %p810_p7, %p243_p8 }
  0x10   : > { %v979_v1 = vld [vmem:[%s1275_s1] sm:$0xff] (!%p244_p9)   ;;  %s1144_s16 = sshll.u32 (!%p244_p9), %s806_s6, 4  ;;  %v980_v2 = vld [vmem:[%s1275_s1 + $0x8] sm:$0xff] (!%p244_p9)   ;;  %vm328_vm0 = vcmask (!%p244_p9), 261120   ;;  %v983_v18 = vld [vmem:[%s1277_s3 + $0x10] sm:$0xff] (!%p244_p9)   ;;  %vm513_vm1 = vcmask (!%p244_p9), 523264  }
  0x11   : > { %247 = sbr.rel (%p244_p9) target bundleno = 767 (0x2ff), region = 48  ;;  %p275_p10 = scmp.lt.s32.totalorder (!%p244_p9), %s1144_s16, 47  ;;  %872 = vmatprep.subr.bf16.mxu1 (!%p244_p9), %v979_v1  ;;  %v981_v3 = vld [vmem:[%s1277_s3] sm:$0xff] (!%p244_p9)   ;;  %v982_v13 = vld [vmem:[%s1277_s3 + $0x8] sm:$0xff] (!%p244_p9)   ;;  %v984_v30 = vld [vmem:[%s1277_s3 + $0x18] sm:$0xff] (!%p244_p9)   ;;  %vm1050_vm2 = vmmov (!%p244_p9), 0  }
  0x12   : > { %873 = vmatpush3.bf16.msra.mxu1 (!%p244_p9), %v979_v1  ;;  %v813_v31 = vld [vmem:[%s1276_s2] ss:$0 sm:$0xff] (!%p244_p9)  ;;  %s272_s23 = sand.u32 (!%p244_p9), 1, %s1039_s27   ;;  %s1232_s9 = scalar_lea.hbm (!%p244_p9), %s1281_s7, %s1144_s16 }
  0x13   : > { %874 = vmatprep.subr.bf16.mxu1 (!%p244_p9), %v980_v2  ;;  %s273_s24 = scalar_lea.vmem (!%p244_p9), [#allocation3], %s272_s23  ;;  %s740_s10 = scalar_lea.sflag (!%p244_p9), [#allocation4], %s272_s23 }
  0x14   : > { %s1052_s15 = smov (!%p244_p9), [#allocation3]  }
  0x15   : > { %s989_s17 = sshll.u32 (!%p244_p9), %s1052_s15, 4  ;;  %s990_s17 = int_to_ptr.vmem [resolvable:$false] %s989_s17 }
  0x16   : > { %875 = vmatpush3.bf16.msra.mxu1 (!%p244_p9), %v980_v2  ;;  %s991_s18 = scalar_lea.vmem (!%p244_p9), %s990_s17, 32 }
  0x17   : > { %892 = vmatprep.subr.bf16.mxu1 (!%p244_p9), %v981_v3 }
  0x18   : > { %s276_s19 = scalar_select %p275_p10, %s1144_s16, 47 }
  0x1a   : > { %s812_s22 = sshll.u32 %s276_s19, 3 }
  0x1b   : > { %s1157_s25 = scalar_lea.vmem %s1274_s0, %s812_s22 }
  0x1c   : > { %v281_v4 = vld [vmem:[%s1157_s25] sm:$0xff]  ;;  %v282_v5 = vld [vmem:[%s1157_s25 + $0x8] sm:$0xff]  ;;  %v283_v6 = vld [vmem:[%s1157_s25 + $0x10] sm:$0xff] }
  0x1d   : > { %v302_v7 = vpack.c.bf16 %v282_v5, %v281_v4  ;;  %v284_v8 = vld [vmem:[%s1157_s25 + $0x18] sm:$0xff]  ;;  %v285_v9 = vld [vmem:[%s1157_s25 + $0x20] sm:$0xff]  ;;  %v286_v10 = vld [vmem:[%s1157_s25 + $0x28] sm:$0xff] }
  0x1e   : > { %v303_v11 = vpack.c.bf16 %v284_v8, %v283_v6  ;;  %v304_v12 = vpack.c.bf16 %v286_v10, %v285_v9  ;;  %v287_v14 = vld [vmem:[%s1157_s25 + $0x30] sm:$0xff]  ;;  %v288_v15 = vld [vmem:[%s1157_s25 + $0x38] sm:$0xff]  ;;  %v289_v16 = vld [vmem:[%s1157_s25 + $0x40] sm:$0xff] }
  0x1f   : > { %876 = vmatprep.mubr.msk.bf16.mxu1 %vm328_vm0, %v302_v7  ;;  %v290_v17 = vld [vmem:[%s1157_s25 + $0x48] sm:$0xff]  ;;  %v305_v19 = vpack.c.bf16 %v288_v15, %v287_v14  ;;  %v291_v21 = vld [vmem:[%s1157_s25 + $0x50] sm:$0xff]  ;;  %v292_v22 = vld [vmem:[%s1157_s25 + $0x58] sm:$0xff] }
  0x20   : > { %877 = vmatmul.mubr.msk.bf16.vlgmr.msra.gmra.mrb[0].mxu1 %vm328_vm0, %v303_v11  ;;  %v306_v20 = vpack.c.bf16 %v290_v17, %v289_v16  ;;  %v293_v23 = vld [vmem:[%s1157_s25 + $0x60] sm:$0xff]  ;;  %v294_v24 = vld [vmem:[%s1157_s25 + $0x68] sm:$0xff]  ;;  %v307_v25 = vpack.c.bf16 %v292_v22, %v291_v21  ;;  %v295_v27 = vld [vmem:[%s1157_s25 + $0x70] sm:$0xff] }
  0x21   : > { %880 = vmatprep.mubr.msk.bf16.mxu1 %vm328_vm0, %v304_v12  ;;  %893 = vmatpush3.bf16.msra.mxu1 %v981_v3  ;;  %v308_v26 = vpack.c.bf16 %v294_v24, %v293_v23  ;;  %v296_v28 = vld [vmem:[%s1157_s25 + $0x78] sm:$0xff]  ;;  %v1049_v24 = vmov 0.0   ;;  %s752_s25 = sshll.u32 %s273_s24, 4  ;;  %s1234_s25 = int_to_ptr.vmem [resolvable:$true] %s752_s25 }
  0x22   : > { %894 = vmatprep.subr.bf16.mxu1 %v982_v13  ;;  %v309_v29 = vpack.c.bf16 %v296_v28, %v295_v27  ;;  %916 = vmatprep.subr.bf16.mxu0 %v1049_v24  ;;  %v824_v27 = vld [vmem:[%s1278_s4] ss:$0 sm:$0xff]  ;;  %s985_s14 = scalar_lea.vmem %s1234_s25, 16  ;;  %p992_p0 = scmp.lt.s32.totalorder %s1234_s25, %s990_s17 }
  0x23   : > { %932 = vmatprep.mubr.msk.bf16.mxu0 %vm1050_vm2, %v1049_v24  ;;  %p986_p11 = scmp.ne.s32.totalorder %s1234_s25, %s985_s14  ;;  %p993_p1 = scmp.lt.s32.totalorder %s991_s18, %s985_s14 }
  0x25   : > { %895 = vmatpush3.bf16.msra.mxu1 %v982_v13  ;;  %p987_p12 = pnand %p986_p11, %p1131_p5  ;;  %p994_p2 = por %p993_p1, %p992_p0 }
  0x26   : > { %896 = vmatprep.subr.bf16.mxu1 %v983_v18 }
  0x27   : > { %p988_p13 = pneg %p987_p12 }
  0x28   : > { %881 = vmatmul.mubr.msk.bf16.gmra.mrb[4].mxu1 %vm328_vm0, %v305_v19 }
  0x29   : > { %884 = vmatprep.mubr.msk.bf16.mxu1 %vm328_vm0, %v306_v20  ;;  %897 = vmatpush3.bf16.msra.mxu1 %v983_v18  ;;  %p995_p3 = pnand %p994_p2, %p988_p13 }
  0x2a   : > { %898 = vmatprep.subr.bf16.mxu1 %v984_v30 }
  0x2d   : > { %899 = vmatpush3.bf16.msra.mxu1 %v984_v30 }
  0x30   : > { %885 = vmatmul.mubr.msk.bf16.gmra.mrb[8].mxu1 %vm328_vm0, %v307_v25  ;;  %v652_v25 = vld [vmem:[#allocation2] sm:$0x1] }
  0x31   : > { %888 = vmatprep.mubr.msk.bf16.mxu1 %vm328_vm0, %v308_v26  ;;  %v1051_v26 = vmov 0  }
  0x32   : > { %978 = vset.pattern.permute.xlu0 %v1051_v26 }
  0x33   : > { %730 = vperm.xlu0 %978, %v652_v25  }
  0x38   : > { %889 = vmatmul.mubr.msk.bf16.gmra.mrb[12].mxu1 %vm328_vm0, %v309_v29 }
  0xf3   : > { %v878_v32 = vpop.f32.mrb[0].mxu1 }
  0xf4   : > { %v396_v33 = vadd.f32 %v878_v32, %v813_v31  ;;  %v387_v34 = vpop.f32.mrb[1].mxu1 }
  0xf5   : > { %v388_v35 = vadd.f32 %v813_v31, %v387_v34  ;;  %v879_v36 = vpop.f32.mrb[2].mxu1 }
  0xf6   : > { %v399_v37 = vadd.f32 %v879_v36, %v813_v31  ;;  %v390_v38 = vpop.f32.mrb[3].mxu1  ;;  %v452_v40 = vmax.f32 %v396_v33, 0.0 }
  0xf7   : > { %v391_v39 = vadd.f32 %v813_v31, %v390_v38  ;;  %v450_v42 = vmax.f32 %v388_v35, 0.0 }
  0xf8   : > { %v453_v41 = vmax.f32 %v399_v37, 0.0 }
  0xf9   : > { %v451_v43 = vmax.f32 %v391_v39, 0.0 }
  0xfa   : > { %v476_v44 = vpack.c.bf16 %v453_v41, %v452_v40 }
  0xfb   : > { %v475_v45 = vpack.c.bf16 %v451_v43, %v450_v42  ;;  %v882_v46 = vpop.f32.mrb[4].mxu1 }
  0xfc   : > { %v412_v47 = vadd.f32 %v882_v46, %v813_v31  ;;  %v403_v48 = vpop.f32.mrb[5].mxu1 }
  0xfd   : > { %v404_v49 = vadd.f32 %v813_v31, %v403_v48  ;;  %900 = vmatprep.mubr.msk.bf16.mxu1 %vm513_vm1, %v475_v45  ;;  %v883_v50 = vpop.f32.mrb[6].mxu1 }
  0xfe   : > { %v456_v51 = vmax.f32 %v412_v47, 0.0  ;;  %v415_v52 = vadd.f32 %v883_v50, %v813_v31  ;;  %901 = vmatmul.mubr.msk.bf16.vlgmr.msra.gmra.mrb[16].mxu1 %vm513_vm1, %v476_v44  ;;  %v406_v53 = vpop.f32.mrb[7].mxu1 }
  0xff   : > { %v454_v54 = vmax.f32 %v404_v49, 0.0  ;;  %v407_v55 = vadd.f32 %v813_v31, %v406_v53 }
 0x100   : > { %v457_v56 = vmax.f32 %v415_v52, 0.0 }
 0x101   : > { %v455_v57 = vmax.f32 %v407_v55, 0.0 }
 0x102   : > { %v478_v58 = vpack.c.bf16 %v457_v56, %v456_v51 }
 0x103   : > { %v477_v59 = vpack.c.bf16 %v455_v57, %v454_v54  ;;  %v886_v60 = vpop.f32.mrb[8].mxu1 }
 0x104   : > { %v428_v61 = vadd.f32 %v886_v60, %v813_v31  ;;  %v419_v62 = vpop.f32.mrb[9].mxu1 }
 0x105   : > { %904 = vmatprep.mubr.msk.bf16.mxu1 %vm513_vm1, %v477_v59  ;;  %v420_v63 = vadd.f32 %v813_v31, %v419_v62  ;;  %v887_v0 = vpop.f32.mrb[10].mxu1 }
 0x106   : > { %905 = vmatmul.mubr.msk.bf16.gmra.mrb[20].mxu1 %vm513_vm1, %v478_v58  ;;  %v460_v1 = vmax.f32 %v428_v61, 0.0  ;;  %v431_v2 = vadd.f32 %v887_v0, %v813_v31  ;;  %v422_v3 = vpop.f32.mrb[11].mxu1 }
 0x107   : > { %v458_v4 = vmax.f32 %v420_v63, 0.0  ;;  %v423_v5 = vadd.f32 %v813_v31, %v422_v3 }
 0x108   : > { %v461_v6 = vmax.f32 %v431_v2, 0.0 }
 0x109   : > { %v459_v7 = vmax.f32 %v423_v5, 0.0 }
 0x10a   : > { %v480_v8 = vpack.c.bf16 %v461_v6, %v460_v1 }
 0x10b   : > { %v479_v9 = vpack.c.bf16 %v459_v7, %v458_v4  ;;  %v890_v10 = vpop.f32.mrb[12].mxu1 }
 0x10c   : > { %v444_v11 = vadd.f32 %v890_v10, %v813_v31  ;;  %v435_v12 = vpop.f32.mrb[13].mxu1 }
 0x10d   : > { %908 = vmatprep.mubr.msk.bf16.mxu1 %vm513_vm1, %v479_v9  ;;  %v436_v13 = vadd.f32 %v813_v31, %v435_v12  ;;  %v891_v14 = vpop.f32.mrb[14].mxu1 }
 0x10e   : > { %909 = vmatmul.mubr.msk.bf16.gmra.mrb[24].mxu1 %vm513_vm1, %v480_v8  ;;  %v464_v15 = vmax.f32 %v444_v11, 0.0  ;;  %v447_v16 = vadd.f32 %v891_v14, %v813_v31  ;;  %v438_v17 = vpop.f32.mrb[15].mxu1 }
 0x10f   : > { %v462_v18 = vmax.f32 %v436_v13, 0.0  ;;  %v439_v19 = vadd.f32 %v813_v31, %v438_v17 }
 0x110   : > { %v465_v20 = vmax.f32 %v447_v16, 0.0 }
 0x111   : > { %v463_v21 = vmax.f32 %v439_v19, 0.0 }
 0x112   : > { %v482_v22 = vpack.c.bf16 %v465_v20, %v464_v15 }
 0x113   : > { %v481_v23 = vpack.c.bf16 %v463_v21, %v462_v18 }
 0x115   : > { %912 = vmatprep.mubr.msk.bf16.mxu1 %vm513_vm1, %v481_v23 }
 0x116   : > { %913 = vmatmul.mubr.msk.bf16.gmra.mrb[28].mxu1 %vm513_vm1, %v482_v22 }
 0x1d1   : > { %v902_v28 = vpop.f32.mrb[16].mxu1 }
 0x1d2   : > { %v581_v29 = vadd.f32 %v902_v28, %v824_v27  ;;  %v572_v30 = vpop.f32.mrb[17].mxu1 }
 0x1d3   : > { %v573_v31 = vadd.f32 %v824_v27, %v572_v30  ;;  %v903_v32 = vpop.f32.mrb[18].mxu1  ;;  %v733_v30 = vlaneseq }
 0x1d4   : > { %v584_v33 = vadd.f32 %v903_v32, %v824_v27  ;;  %v575_v34 = vpop.f32.mrb[19].mxu1  ;;  %v637_v36 = vmax.f32 %v581_v29, 0.0  ;;  %v651_v29 = vld [vmem:[%s1279_s5] sm:$0xf] }
 0x1d5   : > { %v576_v35 = vadd.f32 %v824_v27, %v575_v34  ;;  %v635_v38 = vmax.f32 %v573_v31, 0.0  ;;  %v734_v31 = vshrl.u32 %v733_v30, 7 }
 0x1d6   : > { %v638_v37 = vmax.f32 %v584_v33, 0.0  ;;  %v731_v33 = vpop.permute.xlu0 %730 }
 0x1d7   : > { %v636_v39 = vmax.f32 %v576_v35, 0.0  ;;  %v735_v32 = vsub.s32 0, %v734_v31 }
 0x1d8   : > { %v654_v40 = vpack.c.bf16 %v638_v37, %v637_v36 }
 0x1d9   : > { %v906_v41 = vpop.f32.mrb[20].mxu1  ;;  %v653_v42 = vpack.c.bf16 %v636_v39, %v635_v38  ;;  %v736_v34 = vrot.slane %v731_v33, %v735_v32 }
 0x1da   : > { %v597_v43 = vadd.f32 %v906_v41, %v824_v27  ;;  %v588_v44 = vpop.f32.mrb[21].mxu1  ;;  %v668_v60 = vsel %vm328_vm0, %v654_v40, 0 }
 0x1db   : > { %v589_v45 = vadd.f32 %v824_v27, %v588_v44  ;;  %v907_v46 = vpop.f32.mrb[22].mxu1  ;;  %v665_v47 = vsel %vm328_vm0, %v653_v42, 0 }
 0x1dc   : > { %v641_v48 = vmax.f32 %v597_v43, 0.0  ;;  %v600_v49 = vadd.f32 %v907_v46, %v824_v27  ;;  %917 = vmatpush3.bf16.xpose.msra.mxu0 %v665_v47  ;;  %v591_v50 = vpop.f32.mrb[23].mxu1 }
 0x1dd   : > { %v639_v51 = vmax.f32 %v589_v45, 0.0  ;;  %v592_v52 = vadd.f32 %v824_v27, %v591_v50  ;;  %918 = vmatprep.subr.bf16.mxu0 %v1049_v24 }
 0x1de   : > { %v642_v53 = vmax.f32 %v600_v49, 0.0 }
 0x1df   : > { %v640_v54 = vmax.f32 %v592_v52, 0.0 }
 0x1e0   : > { %v656_v55 = vpack.c.bf16 %v642_v53, %v641_v48 }
 0x1e1   : > { %v655_v56 = vpack.c.bf16 %v640_v54, %v639_v51  ;;  %v910_v57 = vpop.f32.mrb[24].mxu1 }
 0x1e2   : > { %v613_v58 = vadd.f32 %v910_v57, %v824_v27  ;;  %v604_v59 = vpop.f32.mrb[25].mxu1  ;;  %v674_v23 = vsel %vm328_vm0, %v656_v55, 0 }
 0x1e3   : > { %v605_v61 = vadd.f32 %v824_v27, %v604_v59  ;;  %v911_v62 = vpop.f32.mrb[26].mxu1  ;;  %v671_v11 = vsel %vm328_vm0, %v655_v56, 0 }
 0x1e4   : > { %919 = vmatpush3.bf16.xpose.msra.mxu0 %v668_v60  ;;  %v645_v63 = vmax.f32 %v613_v58, 0.0  ;;  %v616_v0 = vadd.f32 %v911_v62, %v824_v27  ;;  %v607_v1 = vpop.f32.mrb[27].mxu1 }
 0x1e5   : > { %v643_v2 = vmax.f32 %v605_v61, 0.0  ;;  %920 = vmatprep.subr.bf16.mxu0 %v1049_v24  ;;  %v608_v3 = vadd.f32 %v824_v27, %v607_v1 }
 0x1e6   : > { %v646_v4 = vmax.f32 %v616_v0, 0.0 }
 0x1e7   : > { %v644_v5 = vmax.f32 %v608_v3, 0.0 }
 0x1e8   : > { %v658_v6 = vpack.c.bf16 %v646_v4, %v645_v63 }
 0x1e9   : > { %v657_v7 = vpack.c.bf16 %v644_v5, %v643_v2  ;;  %v914_v8 = vpop.f32.mrb[28].mxu1 }
 0x1ea   : > { %v629_v9 = vadd.f32 %v914_v8, %v824_v27  ;;  %v620_v10 = vpop.f32.mrb[29].mxu1  ;;  %v680_v26 = vsel %vm328_vm0, %v658_v6, 0 }
 0x1eb   : > { %v621_v12 = vadd.f32 %v824_v27, %v620_v10  ;;  %v915_v13 = vpop.f32.mrb[30].mxu1  ;;  %v677_v25 = vsel %vm328_vm0, %v657_v7, 0 }
 0x1ec   : > { %921 = vmatpush3.bf16.xpose.msra.mxu0 %v671_v11  ;;  %v649_v14 = vmax.f32 %v629_v9, 0.0  ;;  %v632_v15 = vadd.f32 %v915_v13, %v824_v27  ;;  %v623_v16 = vpop.f32.mrb[31].mxu1 }
 0x1ed   : > { %922 = vmatprep.subr.bf16.mxu0 %v1049_v24  ;;  %v647_v17 = vmax.f32 %v621_v12, 0.0  ;;  %v624_v18 = vadd.f32 %v824_v27, %v623_v16 }
 0x1ee   : > { %v650_v19 = vmax.f32 %v632_v15, 0.0 }
 0x1ef   : > { %v648_v20 = vmax.f32 %v624_v18, 0.0 }
 0x1f0   : > { %v660_v21 = vpack.c.bf16 %v650_v19, %v649_v14 }
 0x1f1   : > { %v659_v22 = vpack.c.bf16 %v648_v20, %v647_v17 }
 0x1f2   : > { %v686_v28 = vsel %vm328_vm0, %v660_v21, 0 }
 0x1f3   : > { %v683_v27 = vsel %vm328_vm0, %v659_v22, 0 }
 0x1f4   : > { %923 = vmatpush3.bf16.xpose.msra.mxu0 %v674_v23 }
 0x1f5   : > { %924 = vmatprep.subr.bf16.mxu0 %v1049_v24 }
 0x1fc   : > { %925 = vmatpush3.bf16.xpose.msra.mxu0 %v677_v25 }
 0x1fd   : > { %926 = vmatprep.subr.bf16.mxu0 %v1049_v24 }
 0x204   : > { %927 = vmatpush3.bf16.xpose.msra.mxu0 %v680_v26 }
 0x205   : > { %928 = vmatprep.subr.bf16.mxu0 %v1049_v24 }
 0x20c   : > { %929 = vmatpush3.bf16.xpose.msra.mxu0 %v683_v27 }
 0x20d   : > { %930 = vmatprep.subr.bf16.mxu0 %v1049_v24 }
 0x214   : > { %931 = vmatpush3.bf16.xpose.msra.mxu0 %v686_v28 }
 0x21b   : > { %933 = vmatmul.mubr.msk.bf16.vlgmr.msra.gmra.mrb[0].mxu0 %vm328_vm0, %v651_v29 }
 0x2ee   : > { %v722_v24 = vpop.f32.mrb[0].mxu0 }
 0x2ef   : > { %v737_v35 = vadd.f32 %v736_v34, %v722_v24  ;;  %v934_v36 = vpop.f32.mrb[1].mxu0 }
 0x2f0   : > { %v725_v37 = vpop.f32.mrb[2].mxu0 }
 0x2f1   : > { %738 = vst [vmem:[%s273_s24] sm:$0x1] %v737_v35  ;;  %v935_v38 = vpop.f32.mrb[3].mxu0 }
 0x2f2   : > { %998 = shalt.err (!%p995_p3)
}
 0x2f3   : > { %s999_s16 = scalar_lea.hbm %s1232_s9, 16  ;;  %s1003_s21 = scalar_lea.hbm %s1281_s7, 48 }
 0x2f4   : > { %p1000_p4 = scmp.ne.s32.totalorder %s1232_s9, %s999_s16  ;;  %p1004_p9 = scmp.lt.u32.totalorder %s1232_s9, %s1281_s7 }
 0x2f5   : > { %p1005_p10 = scmp.lt.u32.totalorder %s1003_s21, %s999_s16  ;;  %p1007_p12 = scmp.lt.u32.totalorder %s999_s16, %s1232_s9 }
 0x2f6   : > { %p1001_p7 = pnand %p1000_p4, %p1131_p5 }
 0x2f7   : > { %p1006_p11 = por %p1005_p10, %p1004_p9 }
 0x2f8   : > { %p1002_p8 = pneg %p1001_p7 }
 0x2f9   : > { %p1008_p13 = por %p1007_p12, %p1006_p11 }
 0x2fb   : > { %p1009_p0 = pnand %p1008_p13, %p1002_p8 }
 0x2fd   : > { %1012 = shalt.err (!%p1009_p0)
}
 0x2fe   : > { %936 = dma.vmem_to_hbm [thread:$0]  (%p1131_p5), %s1234_s25, 16, %s1232_s9, %s740_s10  }
 0x2ff PF: > { %p942_p1 = scmp.ge.s32.totalorder %s1047_s29, 2  ;;  %s764_s24 = sand.u32 1, %s1035_s26  }
 0x300   : > { %s765_s6 = scalar_lea.sflag [#allocation4], %s764_s24 }
 0x301   : > { %p939_p2 = pnand %p942_p1, %p1135_p6 }
 0x303   : > { %1030 = dma.done.wait (!%p939_p2), %s765_s6, 16  }
 0x304   : > { %1032 = vsyncadd (!%p939_p2), %s765_s6, 4294967280  ;;  %p19_p3 = scmp.ge.s32.totalorder %s1119_s8, 5   ;;  %s1284_s26 = smov %s1039_s27 }
 0x305   : > { %s1285_s27 = smov %s1043_s28  ;;  %s1286_s28 = smov %s1129_s11 }
 0x306   : > { %s1287_s29 = smov %s1119_s8  ;;  %21 = sbr.rel (!%p19_p3) target bundleno = 6 (0x6), region = 83 }
 0x30d   :  { %769 = vsyncpa [#allocation4], 1 }
 0x30e   :  { %771 = vsyncpa [#allocation4 + $0x1], 1 }

</bundles_post_ra>
